<compile_context>
chip_gen: v7x
topology: tpu7x:2x2x1
jax: 0.10.0
libtpu: 0.0.40
codegen_flags: <defaults>
</compile_context>

<pallas_src>
import functools

import jax
import jax.numpy as jnp
from jax.experimental import pallas as pl
from jax.experimental.pallas import tpu as pltpu


_LANE = 128                 # vreg lane width: last dim of every lane-dense block
_ROW_ALIGN = 16             # sublane alignment safe for f32 / bf16 / int32 packing
_NCORES = 2                 # leading "parallel" grid axis (2 TCs on v7x; harmless elsewhere)
_VMEM_BUDGET = 12 << 20     # pipelined input buffers + resident accumulators
_VMEM_LIMIT = 32 << 20      # explicit scoped-VMEM limit (safe on v5e/v6e/v7x)


def _round_up(x, m):
    return ((x + m - 1) // m) * m


def _cdiv(a, b):
    return -(-a // b)


# ----------------------------------------------------------------- sizing ---

def _max_tile_rows(in_cols_itemsize, acc_cols):
    """Largest tile row count whose VMEM footprint fits the budget.

    in_cols_itemsize: (n_cols, itemsize) per input (double-buffered by the
    BlockSpec pipeline).  acc_cols: last-dim of each resident f32 scratch.
    Last dims are rounded up to 128 lanes -- VMEM tiles pad to (8, 128), so a
    (T, 1) label column really costs T * 128 words.
    """
    per_row = 0
    for cols, isz in in_cols_itemsize:
        per_row += _round_up(cols, _LANE) * isz * 2      # double-buffered input
    for cols in acc_cols:
        per_row += _round_up(cols, _LANE) * 4            # f32 scratch, single copy
    rows = _VMEM_BUDGET // max(per_row, 1)
    return max(_ROW_ALIGN, (rows // _ROW_ALIGN) * _ROW_ALIGN)


def _plan_rows(m_rows, max_tile_rows, ncores):
    """Split m_rows across (ncores x steps) tiles of `tile` rows each."""
    max_tile_rows = max(_ROW_ALIGN, (max_tile_rows // _ROW_ALIGN) * _ROW_ALIGN)
    per_core = _cdiv(max(m_rows, 1), ncores)
    if per_core <= max_tile_rows:
        tile = _round_up(per_core, _ROW_ALIGN)
        steps = 1
    else:
        tile = max_tile_rows
        steps = _cdiv(per_core, tile)
    return tile, steps, ncores * steps * tile


# ---------------------------------------------------------------- padding ---

def _lane_pack(x, rows_total, pad_value):
    """Flatten to 1-D, pad with a neutral value to rows_total*128 elements,
    reshape to a lane-dense (rows_total, 128) slab.  No copy when aligned."""
    flat = x.reshape(-1)
    total = rows_total * _LANE
    if flat.shape[0] != total:
        flat = jnp.pad(flat, (0, total - flat.shape[0]),
                       constant_values=pad_value)
    return flat.reshape(rows_total, _LANE)


def _row_pad(x, rows_total, pad_value):
    if x.shape[0] != rows_total:
        x = jnp.pad(x, ((0, rows_total - x.shape[0]), (0, 0)),
                    constant_values=pad_value)
    return x


# ---------------------------------------------------------------- kernels ---

def _sum_reduce_kernel(contrib_fn, yhat_ref, y_ref, out_ref, acc_ref):
    """Tiled sum-reduction with a tile-shaped accumulator.

    Per step: pure VALU elementwise accumulate.  The single cross-lane /
    cross-sublane XLU reduce and the scalar store happen only in the
    last-step epilogue.  Grid = (core, step); the reduction runs over `step`.
    """
    i = pl.program_id(1)

    @pl.when(i == 0)
    def _():
        acc_ref[...] = jnp.zeros_like(acc_ref)

    acc_ref[...] += contrib_fn(yhat_ref[...], y_ref[...])

    @pl.when(i == pl.num_programs(1) - 1)
    def _():
        out_ref[0] = jnp.sum(acc_ref[...], keepdims=True)   # (1, 1) into (1,1,1) block


def _acc_multiclass_contrib(yhat, y):
    # argmax over classes (first maximal index, like torch.argmax) compared
    # against integer labels; inputs cast to f32 in-kernel (may be bf16).
    # Padded rows carry label -1, so they contribute 0 without any masking.
    x = yhat.astype(jnp.float32)                                # (T, C)
    col = jax.lax.broadcasted_iota(jnp.int32, x.shape, 1)
    maxv = jnp.max(x, axis=1, keepdims=True)
    idx = jnp.where(x == maxv, col, x.shape[1])
    pred = jnp.min(idx, axis=1, keepdims=True)                  # (T, 1)
    return (pred == y).astype(jnp.float32)                      # y int32 (T, 1)


def _acc_binary_contrib(yhat, y):
    # torch.round == jnp.round (round-half-to-even).  Pad values (1.0 vs 0.0)
    # never compare equal, so padded elements contribute 0.
    return (jnp.round(yhat.astype(jnp.float32))
            == y.astype(jnp.float32)).astype(jnp.float32)


def _mse_contrib(yhat, y):
    # Padded elements are 0 on both sides -> zero contribution.
    d = yhat.astype(jnp.float32) - y.astype(jnp.float32)
    return d * d


def _f1_kernel(yhat_ref, y_ref, tp_out_ref, den_out_ref, tp_ref, den_ref):
    # binary_f1_score: f1 = 2*TP / (2*TP + FP + FN) = 2*TP / (sum(pred)+sum(y)).
    # Each core emits its own (TP, sum(pred)+sum(y)) partials; the wrapper
    # combines them (f1 itself is not additive across cores).
    i = pl.program_id(1)

    @pl.when(i == 0)
    def _():
        tp_ref[...] = jnp.zeros_like(tp_ref)
        den_ref[...] = jnp.zeros_like(den_ref)

    yh = yhat_ref[...].astype(jnp.float32)
    yv = y_ref[...].astype(jnp.float32)
    pred = (yh > 0.5).astype(jnp.float32)     # torchmetrics: strict > threshold
    tp_ref[...] += pred * yv
    den_ref[...] += pred + yv                 # fused sum(pred) + sum(y)

    @pl.when(i == pl.num_programs(1) - 1)
    def _():
        tp_out_ref[0] = jnp.sum(tp_ref[...], keepdims=True)
        den_out_ref[0] = jnp.sum(den_ref[...], keepdims=True)


# ------------------------------------------------------------ pallas_call ---

def _reduction_call(kernel, yhat, y, n_out, scratch_shapes, tile, steps, ncores):
    """Row-tiled full reduction -> n_out per-core partials of shape (ncores,1,1)."""

    def in_map(c, i):
        return (c * steps + i, 0)

    out_shape = tuple(jax.ShapeDtypeStruct((ncores, 1, 1), jnp.float32)
                      for _ in range(n_out))
    out_specs = [pl.BlockSpec((1, 1, 1), lambda c, i: (c, 0, 0))
                 for _ in range(n_out)]

    return pl.pallas_call(
        kernel,
        out_shape=out_shape,
        grid_spec=pltpu.PrefetchScalarGridSpec(
            num_scalar_prefetch=0,
            grid=(ncores, steps),
            in_specs=[
                pl.BlockSpec((tile, yhat.shape[1]), in_map),
                pl.BlockSpec((tile, y.shape[1]), in_map),
            ],
            out_specs=out_specs,
            scratch_shapes=scratch_shapes,
        ),
        compiler_params=pltpu.CompilerParams(
            dimension_semantics=("parallel", "arbitrary"),
            vmem_limit_bytes=_VMEM_LIMIT,
        ),
    )(yhat, y)


# ---------------------------------------------------------------- wrapper ---

class Score:
    """Pallas re-implementation of the PyTorch `Score` module forward pass."""

    def __init__(self, metric, max_tile_rows=None, ncores=_NCORES):
        self.metric = metric
        self.higher_is_better = metric in ("accuracy", "auc", "f1")
        self._max_tile_rows = max_tile_rows   # override for testing multi-step path
        self._ncores = ncores
        if metric == "auc":
            # TODO(synk): AUC requires global sort / rank statistics; no clean
            # Pallas TPU equivalent, so it is not implemented here.
            raise NotImplementedError("auc metric has no Pallas implementation")
        if metric not in ("accuracy", "f1", "mse"):
            raise ValueError(f"unknown metric {metric!r}")

    # -- elementwise metrics (binary accuracy / f1 / mse): lane-dense path ---
    def _elementwise(self, y_hat, y, kind):
        n_elem = y_hat.size
        m_rows = _cdiv(n_elem, _LANE)
        isz_h = y_hat.dtype.itemsize
        isz_y = y.dtype.itemsize
        n_acc = 2 if kind == "f1" else 1
        max_rows = self._max_tile_rows or _max_tile_rows(
            [(_LANE, isz_h), (_LANE, isz_y)], [_LANE] * n_acc)
        tile, steps, rows_total = _plan_rows(m_rows, max_rows, self._ncores)

        if kind == "acc":
            # pad yhat=1.0 / y=0.0: round(1.0) != 0.0 -> padded elems add 0
            yh = _lane_pack(y_hat, rows_total, 1.0)
            yv = _lane_pack(y, rows_total, 0.0)
        else:
            # f1 / mse: zeros on both sides contribute 0
            yh = _lane_pack(y_hat, rows_total, 0.0)
            yv = _lane_pack(y, rows_total, 0.0)

        if kind == "f1":
            scratch = [pltpu.VMEM((tile, _LANE), jnp.float32),
                       pltpu.VMEM((tile, _LANE), jnp.float32)]
            tp_parts, den_parts = _reduction_call(
                _f1_kernel, yh, yv, 2, scratch, tile, steps, self._ncores)
            tp = jnp.sum(tp_parts)
            den = jnp.sum(den_parts)
            safe_den = jnp.where(den > 0.0, den, 1.0)
            return jnp.where(den > 0.0, 2.0 * tp / safe_den, 0.0)

        contrib = _acc_binary_contrib if kind == "acc" else _mse_contrib
        kernel = functools.partial(_sum_reduce_kernel, contrib)
        scratch = [pltpu.VMEM((tile, _LANE), jnp.float32)]
        (parts,) = _reduction_call(kernel, yh, yv, 1, scratch,
                                   tile, steps, self._ncores)
        return jnp.sum(parts) / jnp.float32(n_elem)

    # -- multiclass accuracy: rows = batch, lanes = classes -----------------
    def _multiclass_accuracy(self, y_hat, y):
        n, c = y_hat.shape
        labels = y.reshape(-1, 1).astype(jnp.int32)
        max_rows = self._max_tile_rows or _max_tile_rows(
            [(c, y_hat.dtype.itemsize), (1, 4)], [1])
        tile, steps, rows_total = _plan_rows(n, max_rows, self._ncores)

        yh = _row_pad(y_hat, rows_total, 0.0)      # argmax(zeros) == 0
        yl = _row_pad(labels, rows_total, -1)      # label -1 never matches

        kernel = functools.partial(_sum_reduce_kernel, _acc_multiclass_contrib)
        scratch = [pltpu.VMEM((tile, 1), jnp.float32)]
        (parts,) = _reduction_call(kernel, yh, yl, 1, scratch,
                                   tile, steps, self._ncores)
        return jnp.sum(parts) / jnp.float32(n)

    def __call__(self, y_hat, y):
        if self.metric == "accuracy":
            if y_hat.ndim > 1 and y_hat.shape[1] > 1:
                out = self._multiclass_accuracy(y_hat, y)
            else:
                out = self._elementwise(y_hat, y, "acc")
        elif self.metric == "f1":
            out = self._elementwise(y_hat, y, "f1")
        else:  # mse
            out = self._elementwise(y_hat, y, "mse")
        return out if self.higher_is_better else -out


# ------------------------------------------------------------------- main ---

if __name__ == "__main__":
    key = jax.random.PRNGKey(0)
    k1, k2, k3, k4, k5, k6, k7 = jax.random.split(key, 7)

    # multiclass accuracy: batch=8, classes=32 logits
    logits = jax.random.normal(k1, (8, 32), jnp.float32)
    labels = jax.random.randint(k2, (8,), 0, 32)
    acc = Score("accuracy")(logits, labels)

    # binary f1 / mse on (24, 128)
    probs = jax.random.uniform(k3, (24, 128), jnp.float32)
    targets = (jax.random.uniform(k4, (24, 128)) > 0.5).astype(jnp.float32)
    f1 = Score("f1")(probs, targets)

    preds = jax.random.normal(k5, (24, 128), jnp.float32)
    neg_mse = Score("mse")(preds, targets)

    # binary accuracy on a single-column prediction: exercises the
    # lane-dense flatten/pad path for D == 1 inputs
    bacc = Score("accuracy")(probs[:, :1], targets[:, :1])

    # forced multi-step accumulation (steps > 1 per core, both cores)
    big_preds = jax.random.normal(k6, (96, 128), jnp.float32)
    big_probs = jax.nn.sigmoid(big_preds)
    big_targets = (jax.random.uniform(k7, (96, 128)) > 0.5).astype(jnp.float32)
    neg_mse_big = Score("mse", max_tile_rows=16)(big_preds, big_targets)
    f1_big = Score("f1", max_tile_rows=16)(big_probs, big_targets)

    jax.block_until_ready((acc, f1, neg_mse, bacc, neg_mse_big, f1_big))

    # lightweight pure-JAX references
    ref_acc = jnp.mean((jnp.argmax(logits, axis=1) == labels).astype(jnp.float32))
    pred_bin = (probs > 0.5).astype(jnp.float32)
    ref_f1 = 2.0 * jnp.sum(pred_bin * targets) / (jnp.sum(pred_bin) + jnp.sum(targets))
    ref_neg_mse = -jnp.mean((preds - targets) ** 2)
    ref_bacc = jnp.mean((jnp.round(probs[:, :1]) == targets[:, :1]).astype(jnp.float32))
    ref_neg_mse_big = -jnp.mean((big_preds - big_targets) ** 2)
    big_pred_bin = (big_probs > 0.5).astype(jnp.float32)
    ref_f1_big = 2.0 * jnp.sum(big_pred_bin * big_targets) / (
        jnp.sum(big_pred_bin) + jnp.sum(big_targets))

    assert abs(float(acc) - float(ref_acc)) < 1e-5
    assert abs(float(f1) - float(ref_f1)) < 1e-5
    assert abs(float(neg_mse) - float(ref_neg_mse)) < 1e-4
    assert abs(float(bacc) - float(ref_bacc)) < 1e-5
    assert abs(float(neg_mse_big) - float(ref_neg_mse_big)) < 1e-4
    assert abs(float(f1_big) - float(ref_f1_big)) < 1e-5

    print("KERNEL_OK")
</pallas_src>

<mosaic_0001>
module attributes {stable_mosaic.version = 11 : i64} {
  func.func @_sum_reduce_kernel(%arg0: i32, %arg1: i32, %arg2: memref<16x32xf32, #tpu.memory_space<vmem>>, %arg3: memref<16x1xi32, #tpu.memory_space<vmem>>, %arg4: memref<1x1x1xf32, #tpu.memory_space<vmem>>, %arg5: memref<16x1xf32, #tpu.memory_space<vmem>>) attributes {dimension_semantics = [#tpu.dimension_semantics<parallel>, #tpu.dimension_semantics<arbitrary>], iteration_bounds = array<i64: 2, 1>, scalar_prefetch = 0 : i64, scratch_operands = 1 : i64, tpu.core_type = #tpu.core_type<tc>, window_params = [{transform_indices = @transform_0, window_bounds = array<i64: 16, 32>}, {transform_indices = @transform_1, window_bounds = array<i64: 16, 1>}, {transform_indices = @transform_2, window_bounds = array<i64: 1, 1, 1>}]} {
    %c0_i32 = arith.constant 0 : i32
    %0 = arith.cmpi eq, %arg1, %c0_i32 : i32
    %1 = arith.extui %0 : i1 to i32
    %c0_i32_0 = arith.constant 0 : i32
    %2 = arith.cmpi ne, %1, %c0_i32_0 : i32
    scf.if %2 {
      %cst_11 = arith.constant 0.000000e+00 : f32
      %23 = vector.broadcast %cst_11 : f32 to vector<16x1xf32>
      %c0_12 = arith.constant 0 : index
      %c0_13 = arith.constant 0 : index
      %24 = vector.load %arg5[%c0_12, %c0_13] : memref<16x1xf32, #tpu.memory_space<vmem>>, vector<16x1xf32>
      tpu.vector_store %arg5[%c0_12, %c0_13], %23 {strides = array<i32>} : memref<16x1xf32, #tpu.memory_space<vmem>>, vector<16x1xf32>,
    } else {
    }
    %c0 = arith.constant 0 : index
    %c0_1 = arith.constant 0 : index
    %3 = vector.load %arg5[%c0, %c0_1] : memref<16x1xf32, #tpu.memory_space<vmem>>, vector<16x1xf32>
    %c0_2 = arith.constant 0 : index
    %c0_3 = arith.constant 0 : index
    %4 = vector.load %arg2[%c0_2, %c0_3] : memref<16x32xf32, #tpu.memory_space<vmem>>, vector<16x32xf32>
    %c0_4 = arith.constant 0 : index
    %c0_5 = arith.constant 0 : index
    %5 = vector.load %arg3[%c0_4, %c0_5] : memref<16x1xi32, #tpu.memory_space<vmem>>, vector<16x1xi32>
    %6 = tpu.iota {dimensions = array<i32: 1>} : vector<16x32xi32>
    %cst = arith.constant dense<0xFF800000> : vector<16xf32>
    %7 = vector.multi_reduction <maximumf>, %4, %cst [1] : vector<16x32xf32> to vector<16xf32>
    %8 = vector.shape_cast %7 : vector<16xf32> to vector<16x1xf32>
    %9 = vector.broadcast %8 : vector<16x1xf32> to vector<16x32xf32>
    %10 = arith.cmpf oeq, %4, %9 : vector<16x32xf32>
    %c32_i32 = arith.constant 32 : i32
    %11 = vector.broadcast %c32_i32 : i32 to vector<16x32xi32>
    %12 = arith.select %10, %6, %11 : vector<16x32xi1>, vector<16x32xi32>
    %cst_6 = arith.constant dense<2147483647> : vector<16xi32>
    %13 = vector.multi_reduction <minsi>, %12, %cst_6 [1] : vector<16x32xi32> to vector<16xi32>
    %14 = vector.shape_cast %13 : vector<16xi32> to vector<16x1xi32>
    %15 = arith.cmpi eq, %14, %5 : vector<16x1xi32>
    %16 = arith.extui %15 : vector<16x1xi1> to vector<16x1xi32>
    %17 = arith.sitofp %16 : vector<16x1xi32> to vector<16x1xf32>
    %18 = arith.addf %3, %17 : vector<16x1xf32>
    %c0_7 = arith.constant 0 : index
    %c0_8 = arith.constant 0 : index
    %19 = vector.load %arg5[%c0_7, %c0_8] : memref<16x1xf32, #tpu.memory_space<vmem>>, vector<16x1xf32>
    tpu.vector_store %arg5[%c0_7, %c0_8], %18 {strides = array<i32>} : memref<16x1xf32, #tpu.memory_space<vmem>>, vector<16x1xf32>,
    %c0_i32_9 = arith.constant 0 : i32
    %20 = arith.cmpi eq, %arg1, %c0_i32_9 : i32
    %21 = arith.extui %20 : i1 to i32
    %c0_i32_10 = arith.constant 0 : i32
    %22 = arith.cmpi ne, %21, %c0_i32_10 : i32
    scf.if %22 {
      %c0_11 = arith.constant 0 : index
      %c0_12 = arith.constant 0 : index
      %23 = vector.load %arg5[%c0_11, %c0_12] : memref<16x1xf32, #tpu.memory_space<vmem>>, vector<16x1xf32>
      %24 = vector.shape_cast %23 : vector<16x1xf32> to vector<1x16x1xf32>
      %cst_13 = arith.constant dense<0.000000e+00> : vector<1xf32>
      %25 = vector.multi_reduction <add>, %24, %cst_13 [1, 2] : vector<1x16x1xf32> to vector<1xf32>
      %26 = vector.shape_cast %25 : vector<1xf32> to vector<1x1x1xf32>
      %27 = vector.extract %26[0, 0, 0] : f32 from vector<1x1x1xf32>
      %28 = vector.broadcast %27 : f32 to vector<1x1xf32>
      %c0_14 = arith.constant 0 : index
      %c0_15 = arith.constant 0 : index
      %c0_16 = arith.constant 0 : index
      %29 = vector.load %arg4[%c0_14, %c0_15, %c0_16] : memref<1x1x1xf32, #tpu.memory_space<vmem>>, vector<1x1x1xf32>
      %30 = vector.shape_cast %29 : vector<1x1x1xf32> to vector<1x1xf32>
      %31 = vector.shape_cast %28 : vector<1x1xf32> to vector<1x1x1xf32>
      tpu.vector_store %arg4[%c0_14, %c0_15, %c0_16], %31 {strides = array<i32>} : memref<1x1x1xf32, #tpu.memory_space<vmem>>, vector<1x1x1xf32>,
    } else {
    }
    return
  }
  func.func @transform_0(%arg0: i32, %arg1: i32) -> (i32, i32) {
    %c1_i32 = arith.constant 1 : i32
    %0 = arith.muli %arg0, %c1_i32 : i32
    %1 = arith.addi %0, %arg1 : i32
    %c0_i32 = arith.constant 0 : i32
    %c0_i32_0 = arith.constant 0 : i32
    return %1, %c0_i32 : i32, i32
  }
  func.func @transform_1(%arg0: i32, %arg1: i32) -> (i32, i32) {
    %c1_i32 = arith.constant 1 : i32
    %0 = arith.muli %arg0, %c1_i32 : i32
    %1 = arith.addi %0, %arg1 : i32
    %c0_i32 = arith.constant 0 : i32
    %c0_i32_0 = arith.constant 0 : i32
    return %1, %c0_i32 : i32, i32
  }
  func.func @transform_2(%arg0: i32, %arg1: i32) -> (i32, i32, i32) {
    %c0_i32 = arith.constant 0 : i32
    %c0_i32_0 = arith.constant 0 : i32
    %c0_i32_1 = arith.constant 0 : i32
    return %arg0, %c0_i32, %c0_i32_0 : i32, i32, i32
  }
}

</mosaic_0001>

<bundles_post_ra>
// kernel: tpu_custom_call.1
= control target key start
LH: loop header
LB: loop body
LE: loop exit
PB: predicated region body
PF: predicated region fallthrough
CT: control target
= control target key end

     0   :  { %s424_s9 = smov 0   ;;  %s426_s10 = smov 0   ;;  %s482_s0 = inlined_call_operand.vmem [shape: f32[32,32], index: 0, kind: input, shape index: {}]   ;;  %s483_s1 = inlined_call_operand.vmem [shape: s32[32,1], index: 1, kind: input, shape index: {}]   ;;  %s484_s2 = inlined_call_operand.vmem [shape: f32[2,1,1], index: 2, kind: output, shape index: {}]  }
   0x1   :  { %s428_s11 = smov 0  }
   0x2 LB: > { %s24_s12 = sadd.s32 1, %s402_s10  ;;  %p348_p0 = scmp.ge.s32.totalorder %s406_s11, 1  ;;  %s406_s11 = sphi %s428_s11, %s12_s11   ;;  %s402_s10 = sphi %s426_s10, %s486_s10   ;;  %s398_s9 = sphi %s424_s9, %s485_s9  }
   0x3   : > { %p26_p1 = scmp.ge.s32.totalorder %s24_s12, 2  ;;  %p144_p2 = scmp.lt.s32.totalorder %s406_s11, 3 }
   0x5   : > { %s488_s12 = smov (%p26_p1, %s24_s12), 0  ;;  %p145_p3 = pnand %p348_p0, %p144_p2 }
   0x6   : > { %s349_s13 = sshll.u32 (!%p145_p3), %s398_s9, 1  ;;  %vm205_vm0 = vcmask (!%p145_p3), 261120   ;;  %v203_v4 = vlaneseq (!%p145_p3)  ;;  %vm194_vm3 = vcmask (!%p145_p3), 7168   ;;  %v408_v16 = vmov (!%p145_p3), 0.0   ;;  %p187_p5 = scmp.lt.s32.totalorder (!%p145_p3), %s398_s9, 1 }
   0x7   : > { %148 = sbr.rel (%p145_p3) target bundleno = 683 (0x2ab), region = 28  ;;  %p173_p4 = scmp.lt.s32.totalorder (!%p145_p3), %s349_s13, 3  ;;  %195 = vst.msk [vmem:[#allocation2] sm:$0xff] (!%p145_p3), %vm194_vm3, %v408_v16  ;;  %196 = vst.msk [vmem:[#allocation2 + $0x8] sm:$0xff] (!%p145_p3), %vm194_vm3, %v408_v16  ;;  %vm275_vm8 = vcmask (!%p145_p3), 0  }
   0x8   : > { %v204_v5 = vand.u32 (!%p145_p3), 127, %v203_v4 }
   0xe   : > { %s490_s13 = smov (!%p173_p4, %s349_s13), 3  ;;  %v197_v32 = vld [vmem:[#allocation2] sm:$0xff]  ;;  %v198_v40 = vld [vmem:[#allocation2 + $0x8] sm:$0xff]  ;;  %s492_s9 = smov (!%p187_p5, %s398_s9), 1 }
   0xf   : > { %s350_s14 = sshll.u32 %s490_s13, 3  ;;  %s189_s23 = scalar_lea.vmem %s484_s2, %s492_s9 }
  0x10   : > { %s176_s17 = scalar_lea.vmem %s482_s0, %s350_s14  ;;  %s184_s20 = scalar_lea.vmem %s483_s1, %s350_s14 }
  0x11   : > { %v199_v0 = vld [vmem:[%s176_s17] sm:$0xff]  ;;  %v200_v1 = vld [vmem:[%s176_s17 + $0x8] sm:$0xff] }
  0x12   : > { %v206_v2 = vsel %vm205_vm0, %v199_v0, -inf  ;;  %v209_v3 = vsel %vm205_vm0, %v200_v1, -inf  ;;  %v201_v30 = vld [vmem:[%s184_s20] sm:$0xff]  ;;  %v202_v37 = vld [vmem:[%s184_s20 + $0x8] sm:$0xff] }
  0x13   : > { %207 = vmax.xlane.f32.xlu0 %v206_v2 }
  0x17   : > { %210 = vmax.xlane.f32.xlu0 %v209_v3 }
  0xa0   : > { %v208_v6 = vpop.xlane.xlu0 %207 }
  0xa1   : > { %vm212_vm1 = vcmp.eq.f32.partialorder %v199_v0, %v208_v6 }
  0xa2   : > { %v214_v7 = vsel %vm212_vm1, %v204_v5, 32 }
  0xa3   : > { %v216_v8 = vsel %vm205_vm0, %v214_v7, 2147483647 }
  0xa4   : > { %v211_v9 = vpop.xlane.xlu0 %210  ;;  %v218_v10 = vshra.s32 %v216_v8, 16  ;;  %v217_v17 = vand.u32 65535, %v216_v8 }
  0xa5   : > { %vm213_vm2 = vcmp.eq.f32.partialorder %v200_v1, %v211_v9 }
  0xa6   : > { %v215_v11 = vsel %vm213_vm2, %v204_v5, 32  ;;  %v220_v12 = vcvt.s32.f32 %v218_v10  ;;  %v219_v19 = vcvt.s32.f32 %v217_v17 }
  0xa7   : > { %v231_v13 = vsel %vm205_vm0, %v215_v11, 2147483647 }
  0xa8   : > { %221 = vmin.xlane.f32.xlu1 %v220_v12  ;;  %v233_v14 = vshra.s32 %v231_v13, 16  ;;  %v232_v20 = vand.u32 65535, %v231_v13 }
  0xaa   : > { %v235_v15 = vcvt.s32.f32 %v233_v14  ;;  %v234_v23 = vcvt.s32.f32 %v232_v20 }
  0xac   : > { %236 = vmin.xlane.f32.xlu1 %v235_v15 }
 0x135   : > { %v222_v18 = vpop.xlane.xlu1 %221 }
 0x136   : > { %vm223_vm4 = vcmp.eq.f32.partialorder %v220_v12, %v222_v18  ;;  %v228_v25 = vcvt.f32.s32 %v222_v18 }
 0x137   : > { %v224_v21 = vsel %vm223_vm4, %v219_v19, inf }
 0x138   : > { %225 = vmin.xlane.f32.xlu0 %v224_v21  ;;  %v229_v27 = vshll.u32 %v228_v25, 16 }
 0x139   : > { %v237_v22 = vpop.xlane.xlu1 %236 }
 0x13a   : > { %vm238_vm5 = vcmp.eq.f32.partialorder %v235_v15, %v237_v22  ;;  %v243_v28 = vcvt.f32.s32 %v237_v22 }
 0x13b   : > { %v239_v24 = vsel %vm238_vm5, %v234_v23, inf }
 0x13c   : > { %240 = vmin.xlane.f32.xlu1 %v239_v24  ;;  %v244_v34 = vshll.u32 %v243_v28, 16 }
 0x1c5   : > { %v226_v26 = vpop.xlane.xlu0 %225 }
 0x1c6   : > { %v227_v29 = vcvt.f32.s32 %v226_v26 }
 0x1c8   : > { %v230_v31 = vadd.s32 %v229_v27, %v227_v29 }
 0x1c9   : > { %v241_v33 = vpop.xlane.xlu1 %240 }
 0x1ca   : > { %vm246_vm6 = vcmp.eq.s32.totalorder %v230_v31, %v201_v30  ;;  %v242_v35 = vcvt.f32.s32 %v241_v33 }
 0x1cb   : > { %v353_v36 = vsel %vm246_vm6, 1.0, %v408_v16 }
 0x1cc   : > { %v252_v38 = vadd.f32 %v353_v36, %v197_v32  ;;  %v245_v39 = vadd.s32 %v244_v34, %v242_v35 }
 0x1ce   : > { %255 = vst.msk [vmem:[#allocation2] sm:$0xff] %vm194_vm3, %v252_v38  ;;  %vm247_vm7 = vcmp.eq.s32.totalorder %v245_v39, %v202_v37 }
 0x1cf   : > { %v354_v41 = vsel %vm247_vm7, 1.0, %v408_v16 }
 0x1d0   : > { %v253_v42 = vadd.f32 %v354_v41, %v198_v40 }
 0x1d2   : > { %256 = vst.msk [vmem:[#allocation2 + $0x8] sm:$0xff] %vm194_vm3, %v253_v42 }
 0x1d5   : > { %v260_v43 = vld [vmem:[#allocation2] sm:$0xff] }
 0x1d6   : > { %v262_v45 = vsel %vm194_vm3, %v260_v43, 0.0 }
 0x1d9   : > { %v261_v44 = vld [vmem:[#allocation2 + $0x8] sm:$0xff] }
 0x1da   : > { %v263_v46 = vsel %vm194_vm3, %v261_v44, 0.0 }
 0x1db   : > { %v264_v47 = vadd.f32 %v263_v46, %v262_v45 }
 0x1dd   : > { %265 = vadd.xlane.f32.xlu0 %v264_v47 }
 0x26a   : > { %v266_v48 = vpop.xlane.xlu0 %265 }
 0x26b   : > { %v267_v49 = vrot.slane %v266_v48, 4 }
 0x26d   : > { %v268_v50 = vadd.f32 %v267_v49, %v266_v48 }
 0x26f   : > { %v269_v51 = vrot.slane %v268_v50, 2 }
 0x271   : > { %v270_v52 = vadd.f32 %v269_v51, %v268_v50 }
 0x273   : > { %v271_v53 = vrot.slane %v270_v52, 1 }
 0x275   : > { %v272_v54 = vadd.f32 %v271_v53, %v270_v52 }
 0x277   : > { %357 = vpush %v272_v54 }
 0x2a8   : > { %s358_s24 = spop %357 }
 0x2a9   : > { %v274_v55 = vstv %s358_s24 }
 0x2aa   : > { %276 = vst.msk [vmem:[%s189_s23] sm:$0x1] %vm275_vm8, %v274_v55 }
 0x2ab PF: > { %s12_s11 = sadd.s32 1, %s406_s11   ;;  %s485_s9 = smov %s402_s10 }
 0x2ac   : > { %p9_p6 = scmp.ge.s32.totalorder %s12_s11, 4   ;;  %s486_s10 = smov %s488_s12 }
 0x2ae   :  { %11 = sbr.rel (!%p9_p6) target bundleno = 2 (0x2), region = 69 }

</bundles_post_ra>
